<compile_context>
chip_gen: v7x
topology: tpu7x:2x2x1
jax: 0.10.0
libtpu: 0.0.40
codegen_flags: <defaults>
</compile_context>

<pallas_src>
import functools

import numpy as np
import jax
import jax.numpy as jnp
from jax import lax
from jax.experimental import pallas as pl
from jax.experimental.pallas import tpu as pltpu


try:                                       # memory-space enum (newer / older name)
    _VMEM = pltpu.MemorySpace.VMEM
except AttributeError:                     # pragma: no cover
    _VMEM = pltpu.TPUMemorySpace.VMEM


def _round_up(a, b):
    return (a + b - 1) // b * b


def _vmem_capacity_bytes():
    try:
        return int(pltpu.get_tpu_info().vmem_capacity_bytes)
    except Exception:                      # pragma: no cover
        return 64 << 20                    # conservative: v7x per-core VMEM


def _vmem_limit_bytes(est_bytes):
    cap = _vmem_capacity_bytes()
    return int(min(cap * 9 // 10, max(4 * est_bytes, 32 << 20)))


def _auto_rows_per_tile(row_bound, hdim, d, x_dtype, compute_dtype):
    """Largest row tile whose working set fits ~1/4 of this chip's VMEM."""
    dp = _round_up(d, 128)
    budget = _vmem_capacity_bytes() // 4
    c_isz = jnp.dtype(compute_dtype).itemsize
    x_isz = jnp.dtype(x_dtype).itemsize
    weights = 2 * hdim * dp * c_isz + (dp + hdim) * 4
    per_row = 2 * hdim * 4 + 2 * hdim * x_isz + 4 * max(hdim, dp) * 4
    tm = (budget - weights) // max(per_row, 1)
    tm = int(max(8, min(512, tm)))
    tm = min(tm, _round_up(max(row_bound, 1), 8))
    return max(8, (tm // 8) * 8)


def _prep_weights(w_down, b_down, w_up, b_up, hdim, d, dp, compute_dtype):
    """Zero-pad the bottleneck dim to a lane-dense multiple of 128 (exact) and
    cast MXU operands; biases stay f32 (they add into the f32 accumulator)."""
    wd = jnp.zeros((hdim, dp), compute_dtype).at[:, :d].set(
        w_down.astype(compute_dtype))
    bd = jnp.zeros((1, dp), jnp.float32).at[:, :d].set(
        b_down.reshape(1, d).astype(jnp.float32))
    wu = jnp.zeros((dp, hdim), compute_dtype).at[:d, :].set(
        w_up.astype(compute_dtype))
    bu = b_up.reshape(1, hdim).astype(jnp.float32)
    return wd, bd, wu, bu


# --------------------------------------------------------------------------
# Gather path: HBM-resident x, per-row DMA gather, double-buffered prefetch.
# --------------------------------------------------------------------------
def _gather_adapter_kernel(idx_ref, cnt_ref,                        # SMEM prefetch
                           x_hbm, wd_ref, bd_ref, wu_ref, bu_ref,   # inputs
                           out_ref,                                 # (tm, H) tile
                           gbuf, sem):                              # (2*tm, H), DMA((2,))
    tm = out_ref.shape[0]
    p = pl.program_id(0)                   # slice  (parallel, megacore-sharded)
    j = pl.program_id(1)                   # step   (arbitrary, sequential per core)
    n_slices = pl.num_programs(0)
    n_steps = pl.num_programs(1)
    m = cnt_ref[0]                         # number of selected rows

    def start_gather(tile, slot):
        """Issue one row DMA per selected row of `tile` into buffer `slot`."""
        # TODO(synk): coalesce contiguous index runs into one DMA per run.
        base = tile * tm
        nv = jnp.clip(m - base, 0, tm)
        off = slot * tm

        @pl.loop(0, nv)
        def _(i):
            src = x_hbm.at[pl.ds(idx_ref[base + i], 1), :]
            dst = gbuf.at[pl.ds(off + i, 1), :]
            pltpu.make_async_copy(src, dst, sem.at[slot]).start()

    def wait_gather(tile, slot):
        base = tile * tm
        nv = jnp.clip(m - base, 0, tm)
        off = pl.multiple_of(slot * tm, tm)
        tile_view = gbuf.at[pl.ds(off, tm), :]
        row_view = gbuf.at[pl.ds(off, 1), :]

        @pl.when(nv == tm)                 # common case: one wait per tile
        def _():
            pltpu.make_async_copy(tile_view, tile_view, sem.at[slot]).wait()

        @pl.when(jnp.logical_and(nv > 0, nv < tm))   # the single partial tile
        def _():
            @pl.loop(0, nv)
            def _(i):
                pltpu.make_async_copy(row_view, row_view, sem.at[slot]).wait()

    tile = j * n_slices + p                # interleaved tile assignment
    slot = j % 2

    @pl.when(j == 0)                       # prime the per-slice pipeline
    def _():
        start_gather(p, 0)

    wait_gather(tile, slot)                # this tile's rows are now in VMEM

    @pl.when(j + 1 < n_steps)              # prefetch next tile: overlaps compute
    def _():
        start_gather((j + 1) * n_slices + p, 1 - slot)

    base = tile * tm
    nv = jnp.clip(m - base, 0, tm)
    row_ids = lax.broadcasted_iota(jnp.int32, (tm, 1), 0)

    @pl.when(nv > 0)
    def _compute():
        cdt = wd_ref.dtype                 # MXU operand dtype (bf16 / f32)
        off = pl.multiple_of(slot * tm, tm)
        g = gbuf[pl.ds(off, tm), :]
        h = jnp.dot(g.astype(cdt), wd_ref[...],
                    preferred_element_type=jnp.float32) + bd_ref[...]
        h = jnp.maximum(h, 0.0)            # ReLU
        u = jnp.dot(h.astype(cdt), wu_ref[...],
                    preferred_element_type=jnp.float32) + bu_ref[...]
        res = g.astype(jnp.float32) + u    # residual
        out_ref[...] = jnp.where(row_ids < nv, res, 0.0).astype(out_ref.dtype)

    @pl.when(nv == 0)
    def _zero():                           # fully padded tile -> exact zeros
        out_ref[...] = jnp.zeros_like(out_ref)


@functools.partial(
    jax.jit, static_argnames=("tm", "compute_dtype", "num_slices", "row_bound"))
def _gather_forward_padded(mask, x, w_down, b_down, w_up, b_up,
                           *, tm, compute_dtype, num_slices, row_bound):
    n, hdim = x.shape
    d = w_down.shape[1]
    dp = _round_up(d, 128)

    n_tiles = max(1, _round_up(row_bound, tm) // tm)
    num_slices = max(1, min(num_slices, n_tiles))
    steps = _round_up(n_tiles, num_slices) // num_slices
    n_pad = num_slices * steps * tm

    wd, bd, wu, bu = _prep_weights(w_down, b_down, w_up, b_up,
                                   hdim, d, dp, compute_dtype)

    # On-device mask -> selected-row indices + count (scalar prefetch / SMEM).
    # TODO(synk): for very large n keep idx in HBM and DMA per-tile index
    # chunks into SMEM instead of prefetching the whole table.
    idx = jnp.nonzero(mask, size=row_bound, fill_value=0)[0].astype(jnp.int32)
    cnt = jnp.minimum(jnp.sum(mask), row_bound).astype(jnp.int32).reshape(1)

    grid_spec = pltpu.PrefetchScalarGridSpec(
        num_scalar_prefetch=2,
        grid=(num_slices, steps),
        in_specs=[
            pl.BlockSpec(memory_space=pl.ANY),       # x stays in HBM
            pl.BlockSpec(memory_space=_VMEM),        # W_down (single-buffered)
            pl.BlockSpec(memory_space=_VMEM),        # b_down
            pl.BlockSpec(memory_space=_VMEM),        # W_up
            pl.BlockSpec(memory_space=_VMEM),        # b_up
        ],
        out_specs=pl.BlockSpec(
            (tm, hdim), lambda p, j, idx, cnt: (j * num_slices + p, 0)),
        scratch_shapes=[
            pltpu.VMEM((2 * tm, hdim), x.dtype),     # double-buffered gather
            pltpu.SemaphoreType.DMA((2,)),           # one DMA sem per buffer
        ],
    )

    x_isz = jnp.dtype(x.dtype).itemsize
    c_isz = jnp.dtype(compute_dtype).itemsize
    est = (2 * hdim * dp * c_isz + (dp + hdim) * 4   # resident weights/biases
           + 2 * tm * hdim * 4                       # out tile (double buffer)
           + 2 * tm * hdim * x_isz                   # gather buffer
           + 4 * tm * max(hdim, dp) * 4)             # intermediates

    out = pl.pallas_call(
        _gather_adapter_kernel,
        out_shape=jax.ShapeDtypeStruct((n_pad, hdim), x.dtype),
        grid_spec=grid_spec,
        compiler_params=pltpu.CompilerParams(
            dimension_semantics=("parallel", "arbitrary"),
            vmem_limit_bytes=_vmem_limit_bytes(est)),
    )(idx, cnt, x, wd, bd, wu, bu)
    return out, cnt[0]


# --------------------------------------------------------------------------
# Dense path: stream ALL rows with plain BlockSpec pipelining, compact after.
# --------------------------------------------------------------------------
def _dense_adapter_kernel(x_ref, wd_ref, bd_ref, wu_ref, bu_ref, out_ref):
    cdt = wd_ref.dtype
    g = x_ref[...]
    h = jnp.dot(g.astype(cdt), wd_ref[...],
                preferred_element_type=jnp.float32) + bd_ref[...]
    h = jnp.maximum(h, 0.0)
    u = jnp.dot(h.astype(cdt), wu_ref[...],
                preferred_element_type=jnp.float32) + bu_ref[...]
    out_ref[...] = (g.astype(jnp.float32) + u).astype(out_ref.dtype)


@functools.partial(jax.jit, static_argnames=("tm", "compute_dtype", "row_bound"))
def _dense_forward_padded(mask, x, w_down, b_down, w_up, b_up,
                          *, tm, compute_dtype, row_bound):
    n, hdim = x.shape
    d = w_down.shape[1]
    dp = _round_up(d, 128)
    n_pad = _round_up(n, tm)
    xp = x if n_pad == n else jnp.pad(x, ((0, n_pad - n), (0, 0)))

    wd, bd, wu, bu = _prep_weights(w_down, b_down, w_up, b_up,
                                   hdim, d, dp, compute_dtype)

    x_isz = jnp.dtype(x.dtype).itemsize
    c_isz = jnp.dtype(compute_dtype).itemsize
    est = (2 * hdim * dp * c_isz + (dp + hdim) * 4
           + 2 * tm * hdim * (4 + x_isz)
           + 4 * tm * max(hdim, dp) * 4)

    dense = pl.pallas_call(
        _dense_adapter_kernel,
        out_shape=jax.ShapeDtypeStruct((n_pad, hdim), x.dtype),
        grid=(n_pad // tm,),
        in_specs=[
            pl.BlockSpec((tm, hdim), lambda i: (i, 0)),
            pl.BlockSpec(memory_space=_VMEM),
            pl.BlockSpec(memory_space=_VMEM),
            pl.BlockSpec(memory_space=_VMEM),
            pl.BlockSpec(memory_space=_VMEM),
        ],
        out_specs=pl.BlockSpec((tm, hdim), lambda i: (i, 0)),
        compiler_params=pltpu.CompilerParams(
            dimension_semantics=("parallel",),
            vmem_limit_bytes=_vmem_limit_bytes(est)),
    )(xp, wd, bd, wu, bu)[:n]

    idx = jnp.nonzero(mask, size=row_bound, fill_value=0)[0]
    cnt = jnp.minimum(jnp.sum(mask), row_bound).astype(jnp.int32)
    sel = jnp.take(dense, idx, axis=0)
    rows = lax.broadcasted_iota(jnp.int32, (row_bound, 1), 0)
    out = jnp.where(rows < cnt, sel, 0).astype(x.dtype)
    return out, cnt


# --------------------------------------------------------------------------
# Public wrappers.
# --------------------------------------------------------------------------
def adapter_wrapper_forward_padded(pointer_mask, x, w_down, b_down, w_up, b_up,
                                   *, tm=None, compute_dtype=jnp.bfloat16,
                                   path="auto", max_rows=None, num_slices=2):
    """adapter(x[pointer_mask]) into a statically padded buffer, no host sync.

    Returns (out_padded, count): rows [0, count) hold the result, remaining
    rows are zero.  `max_rows` (an upper bound on the selected-row count)
    shrinks the padded output / zero writeback when known.
    """
    n, hdim = x.shape
    mask_np = None
    if not isinstance(pointer_mask, jax.Array):
        mask_np = np.asarray(pointer_mask, dtype=bool).reshape(n)
    mask = jnp.asarray(pointer_mask).astype(bool).reshape(n)

    row_bound = n if max_rows is None else max(1, min(int(max_rows), n))

    if path == "auto":
        if mask_np is not None:            # selectivity known host-side for free
            sel = float(mask_np.mean()) if mask_np.size else 0.0
            path = "dense" if sel >= 0.4 else "gather"
        else:                              # avoid a device sync: default gather
            path = "gather"

    rows_hint = row_bound if path == "gather" else n
    if tm is None:                         # generation-aware (VMEM-budgeted) tile
        tm = _auto_rows_per_tile(rows_hint, hdim, w_down.shape[1],
                                 x.dtype, compute_dtype)
    tm = max(8, (int(tm) // 8) * 8)
    tm = min(tm, _round_up(rows_hint, 8))

    if path == "dense":
        return _dense_forward_padded(mask, x, w_down, b_down, w_up, b_up,
                                     tm=tm, compute_dtype=compute_dtype,
                                     row_bound=row_bound)
    return _gather_forward_padded(mask, x, w_down, b_down, w_up, b_up,
                                  tm=tm, compute_dtype=compute_dtype,
                                  num_slices=max(1, int(num_slices)),
                                  row_bound=row_bound)


def adapter_wrapper_forward(pointer_mask, x, w_down, b_down, w_up, b_up,
                            *, tm=None, compute_dtype=jnp.bfloat16,
                            path="auto", max_rows=None, num_slices=2):
    """PyTorch-equivalent forward: returns adapter(x[pointer_mask]), shape (m, H).

    The data-dependent output row count needs one host-visible scalar; when
    the mask is already a host array this costs nothing, otherwise it is the
    single device->host sync of the call.
    """
    out_padded, cnt = adapter_wrapper_forward_padded(
        pointer_mask, x, w_down, b_down, w_up, b_up, tm=tm,
        compute_dtype=compute_dtype, path=path, max_rows=max_rows,
        num_slices=num_slices)
    if not isinstance(pointer_mask, jax.Array):
        m = int(np.count_nonzero(np.asarray(pointer_mask, dtype=bool)))
    else:
        m = int(jax.device_get(cnt))
    m = min(m, out_padded.shape[0])
    if m == 0:
        return jnp.zeros((0, x.shape[1]), dtype=x.dtype)
    return out_padded[:m]


def _reference(pointer_mask, x, w_down, b_down, w_up, b_up):
    g = np.asarray(x)[np.asarray(pointer_mask, dtype=bool)]
    hdn = np.maximum(
        g @ np.asarray(w_down) + np.asarray(b_down).reshape(1, -1), 0.0)
    return g + hdn @ np.asarray(w_up) + np.asarray(b_up).reshape(1, -1)


if __name__ == "__main__":
    key = jax.random.PRNGKey(0)
    k_x, k_wd, k_bd, k_wu, k_bu, k_m = jax.random.split(key, 6)

    N, H, D = 256, 128, 32                 # tokens, hidden, bottleneck dim

    x = jax.random.normal(k_x, (N, H), dtype=jnp.float32)
    w_down = jax.random.normal(k_wd, (H, D), dtype=jnp.float32) * 0.1
    b_down = jax.random.normal(k_bd, (1, D), dtype=jnp.float32) * 0.1
    w_up = jax.random.normal(k_wu, (D, H), dtype=jnp.float32) * 0.1
    b_up = jax.random.normal(k_bu, (1, H), dtype=jnp.float32) * 0.1

    # Boolean pointer mask over the N rows (~60% selected): with tm=64 and 2
    # parallel slices this exercises full, partial, and empty row tiles, both
    # gather-buffer slots, and the cross-step prefetch.
    pointer_mask = np.asarray(jax.random.bernoulli(k_m, p=0.6, shape=(N,)))
    if not pointer_mask.any():
        pointer_mask[0] = True

    ref = _reference(pointer_mask, x, w_down, b_down, w_up, b_up)

    # Gather path, f32 MXU operands (tight check of gather / residual / bias).
    out_g32 = adapter_wrapper_forward(pointer_mask, x, w_down, b_down, w_up,
                                      b_up, tm=64, compute_dtype=jnp.float32,
                                      path="gather")
    out_g32 = jax.block_until_ready(out_g32)
    assert out_g32.shape == ref.shape, (out_g32.shape, ref.shape)
    np.testing.assert_allclose(np.asarray(out_g32), ref, rtol=2e-2, atol=2e-2)

    # Gather path, bf16 MXU operands, auto (generation-aware) tile size.
    out_gbf = adapter_wrapper_forward(pointer_mask, x, w_down, b_down, w_up,
                                      b_up, compute_dtype=jnp.bfloat16,
                                      path="gather")
    out_gbf = jax.block_until_ready(out_gbf)
    np.testing.assert_allclose(np.asarray(out_gbf), ref, rtol=5e-2, atol=5e-2)

    # Dense streaming path (auto-selected at ~60% selectivity).
    out_d = adapter_wrapper_forward(pointer_mask, x, w_down, b_down, w_up,
                                    b_up, tm=64, compute_dtype=jnp.float32,
                                    path="auto")
    out_d = jax.block_until_ready(out_d)
    np.testing.assert_allclose(np.asarray(out_d), ref, rtol=2e-2, atol=2e-2)

    # Low-selectivity mask through the gather path with a caller-provided row
    # upper bound (shrinks the padded output / zero writeback).
    sparse_mask = np.zeros((N,), dtype=bool)
    sparse_mask[::7] = True
    ref_sparse = _reference(sparse_mask, x, w_down, b_down, w_up, b_up)
    out_s = adapter_wrapper_forward(sparse_mask, x, w_down, b_down, w_up, b_up,
                                    tm=32, compute_dtype=jnp.float32,
                                    path="gather", max_rows=64)
    out_s = jax.block_until_ready(out_s)
    np.testing.assert_allclose(np.asarray(out_s), ref_sparse, rtol=2e-2,
                               atol=2e-2)

    print("KERNEL_OK")
</pallas_src>

<mosaic_0001>
module attributes {stable_mosaic.version = 11 : i64} {
  func.func private @main(%arg0: i32) attributes {dimension_semantics = [#tpu.dimension_semantics<core_parallel>], iteration_bounds = array<i64: 2>, tpu.core_type = #tpu.core_type<sc_scalar_subcore>, window_params = []} {
    return
  }
}

module attributes {stable_mosaic.version = 11 : i64} {
  func.func private @main(%arg0: i32) attributes {dimension_semantics = [#tpu.dimension_semantics<core_parallel>], iteration_bounds = array<i64: 2>, tpu.core_type = #tpu.core_type<sc_scalar_subcore>, window_params = []} {
    return
  }
}

module attributes {stable_mosaic.version = 11 : i64} {
  func.func @_gather_adapter_kernel(%arg0: i32, %arg1: i32, %arg2: memref<256xi32, #tpu.memory_space<smem>>, %arg3: memref<1xi32, #tpu.memory_space<smem>>, %arg4: memref<256x128xf32, #tpu.memory_space<any>>, %arg5: memref<128x128xf32, #tpu.memory_space<vmem>>, %arg6: memref<1x128xf32, #tpu.memory_space<vmem>>, %arg7: memref<128x128xf32, #tpu.memory_space<vmem>>, %arg8: memref<1x128xf32, #tpu.memory_space<vmem>>, %arg9: memref<64x128xf32, #tpu.memory_space<vmem>>, %arg10: memref<128x128xf32, #tpu.memory_space<vmem>>, %arg11: memref<2x!tpu.dma_semaphore, #tpu.memory_space<semaphore_mem>>) attributes {dimension_semantics = [#tpu.dimension_semantics<parallel>, #tpu.dimension_semantics<arbitrary>], iteration_bounds = array<i64: 2, 2>, scalar_prefetch = 2 : i64, scratch_operands = 2 : i64, tpu.core_type = #tpu.core_type<tc>, window_params = [{}, {pipeline_mode = #tpu.pipeline_mode<synchronous>, transform_indices = @transform_1, window_bounds = array<i64: 128, 128>}, {pipeline_mode = #tpu.pipeline_mode<synchronous>, transform_indices = @transform_2, window_bounds = array<i64: 1, 128>}, {pipeline_mode = #tpu.pipeline_mode<synchronous>, transform_indices = @transform_3, window_bounds = array<i64: 128, 128>}, {pipeline_mode = #tpu.pipeline_mode<synchronous>, transform_indices = @transform_4, window_bounds = array<i64: 1, 128>}, {transform_indices = @transform_5, window_bounds = array<i64: 64, 128>}]} {
    %c0 = arith.constant 0 : index
    %0 = memref.load %arg3[%c0] : memref<1xi32, #tpu.memory_space<smem>>
    %c2_i32 = arith.constant 2 : i32
    %1 = arith.muli %arg1, %c2_i32 : i32
    %2 = arith.addi %1, %arg0 : i32
    %c2_i32_0 = arith.constant 2 : i32
    %c0_i32 = arith.constant 0 : i32
    %3 = arith.cmpi eq, %c2_i32_0, %c0_i32 : i32
    %c1_i32 = arith.constant 1 : i32
    %4 = arith.select %3, %c1_i32, %c2_i32_0 : i32
    %5 = arith.remsi %arg1, %4 : i32
    %c0_i32_1 = arith.constant 0 : i32
    %6 = arith.cmpi ne, %5, %c0_i32_1 : i32
    %c0_i32_2 = arith.constant 0 : i32
    %7 = arith.cmpi slt, %5, %c0_i32_2 : i32
    %c0_i32_3 = arith.constant 0 : i32
    %8 = arith.cmpi slt, %4, %c0_i32_3 : i32
    %9 = arith.xori %7, %8 : i1
    %10 = arith.andi %9, %6 : i1
    %11 = arith.addi %5, %4 : i32
    %12 = arith.select %10, %11, %5 : i32
    %c0_i32_4 = arith.constant 0 : i32
    %13 = arith.cmpi eq, %arg1, %c0_i32_4 : i32
    %14 = arith.extui %13 : i1 to i32
    %c0_i32_5 = arith.constant 0 : i32
    %15 = arith.cmpi ne, %14, %c0_i32_5 : i32
    scf.if %15 {
      %c64_i32_24 = arith.constant 64 : i32
      %45 = arith.muli %arg0, %c64_i32_24 : i32
      %46 = arith.subi %0, %45 : i32
      %c0_i32_25 = arith.constant 0 : i32
      %c64_i32_26 = arith.constant 64 : i32
      %47 = arith.maxsi %c0_i32_25, %46 : i32
      %48 = arith.minsi %c64_i32_26, %47 : i32
      %c0_i32_27 = arith.constant 0 : i32
      %49 = arith.subi %48, %c0_i32_27 : i32
      %c1_i32_28 = arith.constant 1 : i32
      %c1_i32_29 = arith.constant 1 : i32
      %50 = arith.subi %c1_i32_28, %c1_i32_29 : i32
      %51 = arith.addi %49, %50 : i32
      %c1_i32_30 = arith.constant 1 : i32
      %52 = arith.divsi %51, %c1_i32_30 : i32
      %c1_i32_31 = arith.constant 1 : i32
      %c0_i32_32 = arith.constant 0 : i32
      %c0_i32_33 = arith.constant 0 : i32
      %53 = arith.subi %52, %c0_i32_33 : i32
      %54 = arith.addi %c0_i32_33, %53 : i32
      %c1_i32_34 = arith.constant 1 : i32
      scf.for %arg12 = %c0_i32_33 to %54 step %c1_i32_34  : i32 {
        %55 = arith.muli %arg12, %c1_i32_31 : i32
        %56 = arith.addi %c0_i32_32, %55 : i32
        %57 = arith.addi %45, %56 : i32
        %58 = arith.index_cast %57 : i32 to index
        %59 = memref.load %arg2[%58] : memref<256xi32, #tpu.memory_space<smem>>
        %c0_i32_35 = arith.constant 0 : i32
        %60 = arith.addi %c0_i32_35, %56 : i32
        %c0_i32_36 = arith.constant 0 : i32
        %c0_i32_37 = arith.constant 0 : i32
        %61 = tpu.memref_slice %arg4[%59, %c0_i32_37] : memref<256x128xf32, #tpu.memory_space<any>> -> memref<1x128xf32, #tpu.memory_space<any>>
        %c0_i32_38 = arith.constant 0 : i32
        %62 = tpu.memref_slice %arg10[%60, %c0_i32_38] : memref<128x128xf32, #tpu.memory_space<vmem>> -> memref<1x128xf32, #tpu.memory_space<vmem>>
        %63 = tpu.memref_slice %arg11[%c0_i32_36] : memref<2x!tpu.dma_semaphore, #tpu.memory_space<semaphore_mem>> -> memref<1x!tpu.dma_semaphore, #tpu.memory_space<semaphore_mem>>
        %64 = tpu.memref_squeeze %63 : memref<1x!tpu.dma_semaphore, #tpu.memory_space<semaphore_mem>> -> memref<!tpu.dma_semaphore, #tpu.memory_space<semaphore_mem>>
        tpu.enqueue_dma source(%61 : memref<1x128xf32, #tpu.memory_space<any>>) target(%62 : memref<1x128xf32, #tpu.memory_space<vmem>>) target_semaphore(%64 : memref<!tpu.dma_semaphore, #tpu.memory_space<semaphore_mem>>)
      }
    } else {
    }
    %c64_i32 = arith.constant 64 : i32
    %16 = arith.muli %2, %c64_i32 : i32
    %17 = arith.subi %0, %16 : i32
    %c0_i32_6 = arith.constant 0 : i32
    %c64_i32_7 = arith.constant 64 : i32
    %18 = arith.maxsi %c0_i32_6, %17 : i32
    %19 = arith.minsi %c64_i32_7, %18 : i32
    %c64_i32_8 = arith.constant 64 : i32
    %20 = arith.muli %12, %c64_i32_8 : i32
    %21 = tpu.assume_multiple %20, 64 : i32
    %c64_i32_9 = arith.constant 64 : i32
    %22 = arith.cmpi eq, %19, %c64_i32_9 : i32
    %23 = arith.extui %22 : i1 to i32
    %c0_i32_10 = arith.constant 0 : i32
    %24 = arith.cmpi ne, %23, %c0_i32_10 : i32
    scf.if %24 {
      %c0_i32_24 = arith.constant 0 : i32
      %45 = tpu.memref_slice %arg10[%21, %c0_i32_24] : memref<128x128xf32, #tpu.memory_space<vmem>> -> memref<64x128xf32, #tpu.memory_space<vmem>>
      %c0_i32_25 = arith.constant 0 : i32
      %46 = tpu.memref_slice %arg10[%21, %c0_i32_25] : memref<128x128xf32, #tpu.memory_space<vmem>> -> memref<64x128xf32, #tpu.memory_space<vmem>>
      %47 = tpu.memref_slice %arg11[%12] : memref<2x!tpu.dma_semaphore, #tpu.memory_space<semaphore_mem>> -> memref<1x!tpu.dma_semaphore, #tpu.memory_space<semaphore_mem>>
      %48 = tpu.memref_squeeze %47 : memref<1x!tpu.dma_semaphore, #tpu.memory_space<semaphore_mem>> -> memref<!tpu.dma_semaphore, #tpu.memory_space<semaphore_mem>>
      tpu.wait_dma2 semaphore(%48 : memref<!tpu.dma_semaphore, #tpu.memory_space<semaphore_mem>>) src(%45 : memref<64x128xf32, #tpu.memory_space<vmem>>) dst(%46 : memref<64x128xf32, #tpu.memory_space<vmem>>)
    } else {
    }
    %c0_i32_11 = arith.constant 0 : i32
    %25 = arith.cmpi sgt, %19, %c0_i32_11 : i32
    %c64_i32_12 = arith.constant 64 : i32
    %26 = arith.cmpi slt, %19, %c64_i32_12 : i32
    %27 = arith.andi %25, %26 : i1
    %28 = arith.extui %27 : i1 to i32
    %c0_i32_13 = arith.constant 0 : i32
    %29 = arith.cmpi ne, %28, %c0_i32_13 : i32
    scf.if %29 {
      %c0_i32_24 = arith.constant 0 : i32
      %45 = arith.subi %19, %c0_i32_24 : i32
      %c1_i32_25 = arith.constant 1 : i32
      %c1_i32_26 = arith.constant 1 : i32
      %46 = arith.subi %c1_i32_25, %c1_i32_26 : i32
      %47 = arith.addi %45, %46 : i32
      %c1_i32_27 = arith.constant 1 : i32
      %48 = arith.divsi %47, %c1_i32_27 : i32
      %c1_i32_28 = arith.constant 1 : i32
      %c0_i32_29 = arith.constant 0 : i32
      %c0_i32_30 = arith.constant 0 : i32
      %49 = arith.subi %48, %c0_i32_30 : i32
      %50 = arith.addi %c0_i32_30, %49 : i32
      %c1_i32_31 = arith.constant 1 : i32
      scf.for %arg12 = %c0_i32_30 to %50 step %c1_i32_31  : i32 {
        %51 = arith.muli %arg12, %c1_i32_28 : i32
        %52 = arith.addi %c0_i32_29, %51 : i32
        %c0_i32_32 = arith.constant 0 : i32
        %53 = tpu.memref_slice %arg10[%21, %c0_i32_32] : memref<128x128xf32, #tpu.memory_space<vmem>> -> memref<1x128xf32, #tpu.memory_space<vmem>>
        %c0_i32_33 = arith.constant 0 : i32
        %54 = tpu.memref_slice %arg10[%21, %c0_i32_33] : memref<128x128xf32, #tpu.memory_space<vmem>> -> memref<1x128xf32, #tpu.memory_space<vmem>>
        %55 = tpu.memref_slice %arg11[%12] : memref<2x!tpu.dma_semaphore, #tpu.memory_space<semaphore_mem>> -> memref<1x!tpu.dma_semaphore, #tpu.memory_space<semaphore_mem>>
        %56 = tpu.memref_squeeze %55 : memref<1x!tpu.dma_semaphore, #tpu.memory_space<semaphore_mem>> -> memref<!tpu.dma_semaphore, #tpu.memory_space<semaphore_mem>>
        tpu.wait_dma2 semaphore(%56 : memref<!tpu.dma_semaphore, #tpu.memory_space<semaphore_mem>>) src(%53 : memref<1x128xf32, #tpu.memory_space<vmem>>) dst(%54 : memref<1x128xf32, #tpu.memory_space<vmem>>)
      }
    } else {
    }
    %c1_i32_14 = arith.constant 1 : i32
    %30 = arith.addi %arg1, %c1_i32_14 : i32
    %c2_i32_15 = arith.constant 2 : i32
    %31 = arith.cmpi slt, %30, %c2_i32_15 : i32
    %32 = arith.extui %31 : i1 to i32
    %c0_i32_16 = arith.constant 0 : i32
    %33 = arith.cmpi ne, %32, %c0_i32_16 : i32
    scf.if %33 {
      %c1_i32_24 = arith.constant 1 : i32
      %45 = arith.addi %arg1, %c1_i32_24 : i32
      %c2_i32_25 = arith.constant 2 : i32
      %46 = arith.muli %45, %c2_i32_25 : i32
      %47 = arith.addi %46, %arg0 : i32
      %c1_i32_26 = arith.constant 1 : i32
      %48 = arith.subi %c1_i32_26, %12 : i32
      %c64_i32_27 = arith.constant 64 : i32
      %49 = arith.muli %47, %c64_i32_27 : i32
      %50 = arith.subi %0, %49 : i32
      %c0_i32_28 = arith.constant 0 : i32
      %c64_i32_29 = arith.constant 64 : i32
      %51 = arith.maxsi %c0_i32_28, %50 : i32
      %52 = arith.minsi %c64_i32_29, %51 : i32
      %c64_i32_30 = arith.constant 64 : i32
      %53 = arith.muli %48, %c64_i32_30 : i32
      %c0_i32_31 = arith.constant 0 : i32
      %54 = arith.subi %52, %c0_i32_31 : i32
      %c1_i32_32 = arith.constant 1 : i32
      %c1_i32_33 = arith.constant 1 : i32
      %55 = arith.subi %c1_i32_32, %c1_i32_33 : i32
      %56 = arith.addi %54, %55 : i32
      %c1_i32_34 = arith.constant 1 : i32
      %57 = arith.divsi %56, %c1_i32_34 : i32
      %c1_i32_35 = arith.constant 1 : i32
      %c0_i32_36 = arith.constant 0 : i32
      %c0_i32_37 = arith.constant 0 : i32
      %58 = arith.subi %57, %c0_i32_37 : i32
      %59 = arith.addi %c0_i32_37, %58 : i32
      %c1_i32_38 = arith.constant 1 : i32
      scf.for %arg12 = %c0_i32_37 to %59 step %c1_i32_38  : i32 {
        %60 = arith.muli %arg12, %c1_i32_35 : i32
        %61 = arith.addi %c0_i32_36, %60 : i32
        %62 = arith.addi %49, %61 : i32
        %63 = arith.index_cast %62 : i32 to index
        %64 = memref.load %arg2[%63] : memref<256xi32, #tpu.memory_space<smem>>
        %65 = arith.addi %53, %61 : i32
        %c0_i32_39 = arith.constant 0 : i32
        %66 = tpu.memref_slice %arg4[%64, %c0_i32_39] : memref<256x128xf32, #tpu.memory_space<any>> -> memref<1x128xf32, #tpu.memory_space<any>>
        %c0_i32_40 = arith.constant 0 : i32
        %67 = tpu.memref_slice %arg10[%65, %c0_i32_40] : memref<128x128xf32, #tpu.memory_space<vmem>> -> memref<1x128xf32, #tpu.memory_space<vmem>>
        %68 = tpu.memref_slice %arg11[%48] : memref<2x!tpu.dma_semaphore, #tpu.memory_space<semaphore_mem>> -> memref<1x!tpu.dma_semaphore, #tpu.memory_space<semaphore_mem>>
        %69 = tpu.memref_squeeze %68 : memref<1x!tpu.dma_semaphore, #tpu.memory_space<semaphore_mem>> -> memref<!tpu.dma_semaphore, #tpu.memory_space<semaphore_mem>>
        tpu.enqueue_dma source(%66 : memref<1x128xf32, #tpu.memory_space<any>>) target(%67 : memref<1x128xf32, #tpu.memory_space<vmem>>) target_semaphore(%69 : memref<!tpu.dma_semaphore, #tpu.memory_space<semaphore_mem>>)
      }
    } else {
    }
    %c64_i32_17 = arith.constant 64 : i32
    %34 = arith.muli %2, %c64_i32_17 : i32
    %35 = arith.subi %0, %34 : i32
    %c0_i32_18 = arith.constant 0 : i32
    %c64_i32_19 = arith.constant 64 : i32
    %36 = arith.maxsi %c0_i32_18, %35 : i32
    %37 = arith.minsi %c64_i32_19, %36 : i32
    %38 = tpu.iota {dimensions = array<i32: 0>} : vector<64x1xi32>
    %c0_i32_20 = arith.constant 0 : i32
    %39 = arith.cmpi sgt, %37, %c0_i32_20 : i32
    %40 = arith.extui %39 : i1 to i32
    %c0_i32_21 = arith.constant 0 : i32
    %41 = arith.cmpi ne, %40, %c0_i32_21 : i32
    scf.if %41 {
      %c64_i32_24 = arith.constant 64 : i32
      %45 = arith.muli %12, %c64_i32_24 : i32
      %46 = tpu.assume_multiple %45, 64 : i32
      %47 = arith.index_cast %46 : i32 to index
      %c0_25 = arith.constant 0 : index
      %48 = vector.load %arg10[%47, %c0_25] : memref<128x128xf32, #tpu.memory_space<vmem>>, vector<64x128xf32>
      %c0_26 = arith.constant 0 : index
      %c0_27 = arith.constant 0 : index
      %49 = vector.load %arg5[%c0_26, %c0_27] : memref<128x128xf32, #tpu.memory_space<vmem>>, vector<128x128xf32>
      %cst = arith.constant dense<0.000000e+00> : vector<64x128xf32>
      %50 = tpu.matmul %48, %49, %cst {dimension_numbers = #tpu.dot_dimension_numbers<[1], [0], [0], [1], [0, 0, 1, 1], [], []>} : vector<64x128xf32>, vector<128x128xf32>, vector<64x128xf32> -> vector<64x128xf32>
      %c0_28 = arith.constant 0 : index
      %c0_29 = arith.constant 0 : index
      %51 = vector.load %arg6[%c0_28, %c0_29] : memref<1x128xf32, #tpu.memory_space<vmem>>, vector<1x128xf32>
      %52 = vector.broadcast %51 : vector<1x128xf32> to vector<64x128xf32>
      %53 = arith.addf %50, %52 : vector<64x128xf32>
      %cst_30 = arith.constant 0.000000e+00 : f32
      %54 = vector.broadcast %cst_30 : f32 to vector<64x128xf32>
      %55 = arith.maximumf %53, %54 : vector<64x128xf32>
      %c0_31 = arith.constant 0 : index
      %c0_32 = arith.constant 0 : index
      %56 = vector.load %arg7[%c0_31, %c0_32] : memref<128x128xf32, #tpu.memory_space<vmem>>, vector<128x128xf32>
      %cst_33 = arith.constant dense<0.000000e+00> : vector<64x128xf32>
      %57 = tpu.matmul %55, %56, %cst_33 {dimension_numbers = #tpu.dot_dimension_numbers<[1], [0], [0], [1], [0, 0, 1, 1], [], []>} : vector<64x128xf32>, vector<128x128xf32>, vector<64x128xf32> -> vector<64x128xf32>
      %c0_34 = arith.constant 0 : index
      %c0_35 = arith.constant 0 : index
      %58 = vector.load %arg8[%c0_34, %c0_35] : memref<1x128xf32, #tpu.memory_space<vmem>>, vector<1x128xf32>
      %59 = vector.broadcast %58 : vector<1x128xf32> to vector<64x128xf32>
      %60 = arith.addf %57, %59 : vector<64x128xf32>
      %61 = arith.addf %48, %60 : vector<64x128xf32>
      %62 = vector.broadcast %37 : i32 to vector<64x1xi32>
      %63 = arith.cmpi slt, %38, %62 : vector<64x1xi32>
      %cst_36 = arith.constant 0.000000e+00 : f32
      %64 = vector.shape_cast %63 : vector<64x1xi1> to vector<64x1xi1>
      %65 = vector.broadcast %64 : vector<64x1xi1> to vector<64x128xi1>
      %66 = vector.broadcast %cst_36 : f32 to vector<64x128xf32>
      %67 = arith.select %65, %61, %66 : vector<64x128xi1>, vector<64x128xf32>
      %c0_37 = arith.constant 0 : index
      %c0_38 = arith.constant 0 : index
      %68 = vector.load %arg9[%c0_37, %c0_38] : memref<64x128xf32, #tpu.memory_space<vmem>>, vector<64x128xf32>
      tpu.vector_store %arg9[%c0_37, %c0_38], %67 {strides = array<i32>} : memref<64x128xf32, #tpu.memory_space<vmem>>, vector<64x128xf32>,
    } else {
    }
    %c0_i32_22 = arith.constant 0 : i32
    %42 = arith.cmpi eq, %37, %c0_i32_22 : i32
    %43 = arith.extui %42 : i1 to i32
    %c0_i32_23 = arith.constant 0 : i32
    %44 = arith.cmpi ne, %43, %c0_i32_23 : i32
    scf.if %44 {
      %cst = arith.constant 0.000000e+00 : f32
      %45 = vector.broadcast %cst : f32 to vector<64x128xf32>
      %c0_24 = arith.constant 0 : index
      %c0_25 = arith.constant 0 : index
      %46 = vector.load %arg9[%c0_24, %c0_25] : memref<64x128xf32, #tpu.memory_space<vmem>>, vector<64x128xf32>
      tpu.vector_store %arg9[%c0_24, %c0_25], %45 {strides = array<i32>} : memref<64x128xf32, #tpu.memory_space<vmem>>, vector<64x128xf32>,
    } else {
    }
    return
  }
  func.func @transform_1(%arg0: i32, %arg1: i32, %arg2: memref<256xi32, #tpu.memory_space<smem>>, %arg3: memref<1xi32, #tpu.memory_space<smem>>) -> (i32, i32) {
    %c0_i32 = arith.constant 0 : i32
    %c0_i32_0 = arith.constant 0 : i32
    %c0_i32_1 = arith.constant 0 : i32
    return %c0_i32, %c0_i32_0 : i32, i32
  }
  func.func @transform_2(%arg0: i32, %arg1: i32, %arg2: memref<256xi32, #tpu.memory_space<smem>>, %arg3: memref<1xi32, #tpu.memory_space<smem>>) -> (i32, i32) {
    %c0_i32 = arith.constant 0 : i32
    %c0_i32_0 = arith.constant 0 : i32
    %c0_i32_1 = arith.constant 0 : i32
    return %c0_i32, %c0_i32_0 : i32, i32
  }
  func.func @transform_3(%arg0: i32, %arg1: i32, %arg2: memref<256xi32, #tpu.memory_space<smem>>, %arg3: memref<1xi32, #tpu.memory_space<smem>>) -> (i32, i32) {
    %c0_i32 = arith.constant 0 : i32
    %c0_i32_0 = arith.constant 0 : i32
    %c0_i32_1 = arith.constant 0 : i32
    return %c0_i32, %c0_i32_0 : i32, i32
  }
  func.func @transform_4(%arg0: i32, %arg1: i32, %arg2: memref<256xi32, #tpu.memory_space<smem>>, %arg3: memref<1xi32, #tpu.memory_space<smem>>) -> (i32, i32) {
    %c0_i32 = arith.constant 0 : i32
    %c0_i32_0 = arith.constant 0 : i32
    %c0_i32_1 = arith.constant 0 : i32
    return %c0_i32, %c0_i32_0 : i32, i32
  }
  func.func @transform_5(%arg0: i32, %arg1: i32, %arg2: memref<256xi32, #tpu.memory_space<smem>>, %arg3: memref<1xi32, #tpu.memory_space<smem>>) -> (i32, i32) {
    %c2_i32 = arith.constant 2 : i32
    %0 = arith.muli %arg1, %c2_i32 : i32
    %1 = arith.addi %0, %arg0 : i32
    %c0_i32 = arith.constant 0 : i32
    %c0_i32_0 = arith.constant 0 : i32
    return %1, %c0_i32 : i32, i32
  }
}

</mosaic_0001>

<bundles_post_ra>
// kernel: _gather_forward_padded.1
= control target key start
LH: loop header
LB: loop body
LE: loop exit
PB: predicated region body
PF: predicated region fallthrough
CT: control target
= control target key end

     0   :  { %s1792_s0 = inlined_call_operand.vmem [shape: s32[256], index: 0, kind: input, shape index: {}]   ;;  %s1793_s1 = inlined_call_operand.<no memory space> [shape: s32[1], index: 1, kind: input, shape index: {}]   ;;  %s1794_s2 = inlined_call_operand.vmem [shape: f32[256,128], index: 2, kind: input, shape index: {}]   ;;  %s1795_s3 = inlined_call_operand.vmem [shape: f32[128,128], index: 3, kind: input, shape index: {}]   ;;  %s1796_s4 = inlined_call_operand.vmem [shape: f32[1,128], index: 4, kind: input, shape index: {}]   ;;  %s1797_s5 = inlined_call_operand.vmem [shape: f32[128,128], index: 5, kind: input, shape index: {}]   ;;  %s1798_s6 = inlined_call_operand.vmem [shape: f32[1,128], index: 6, kind: input, shape index: {}]   ;;  %s1799_s7 = inlined_call_operand.hbm [shape: f32[256,128], index: 7, kind: output, shape index: {}]  }
   0x1   :  { %s12_s26 = sshll.u32 %s1792_s0, 4  ;;  %16 = sst [smem:[#allocation6]] %s1793_s1  ;;  %s13_s26 = int_to_ptr.vmem [resolvable:$true] %s12_s26 }
   0x2   :  { %s1231_s29 = scalar_lea.vmem %s13_s26, 32  ;;  %p1236_p1 = scmp.lt.s32.totalorder %s13_s26, %s13_s26 }
   0x3   :  { %p1232_p0 = scmp.ne.s32.totalorder %s13_s26, %s1231_s29  ;;  %p1237_p2 = scmp.lt.s32.totalorder %s1231_s29, %s1231_s29 }
   0x5   :  { %p1238_p3 = por %p1237_p2, %p1236_p1 }
   0x7   :  { %p1239_p4 = pnand %p1238_p3, %p1232_p0 }
   0x9   :  { %1242 = shalt.err (!%p1239_p4)  }
   0xa   :  { %s1371_s30 = smov [#allocation5]  }
   0xb   :  { %15 = dma.vmem_to_smem %s13_s26, 32, %s1371_s30, [#allocation4] }
   0xc   :  { %1315 = dma.done.wait [#allocation4], 32 }
   0xd   :  { %1316 = vsyncadd [#allocation4], 4294967264 }
   0xe   :  { %18 = sfence }
   0xf   :  { %19 = vsyncpa [#allocation8], 0 }
  0x10   :  { %21 = vsyncpa [#allocation8 + $0x1], 0  ;;  %s1422_s0 = smov 0   ;;  %s1424_s8 = smov 0  }
  0x11   :  { %s1426_s1 = smov 0   ;;  %s1428_s9 = smov 0  }
  0x12   :  { %s1430_s10 = smov 0   ;;  %s1432_s11 = smov 0  }
  0x13   :  { %s1434_s12 = smov 0   ;;  %s1436_s13 = smov 0  }
  0x14 LB: > { %1806 = sst [smem:[#allocation15_spill]] %s1349_s11  ;;  %s870_s14 = sadd.s32 4294967295, %s1357_s13   ;;  %s1357_s13 = sphi %s1436_s13, %s27_s13   ;;  %s1353_s12 = sphi %s1434_s12, %s1818_s12   ;;  %s1349_s11 = sphi %s1432_s11, %s1817_s11   ;;  %s1345_s10 = sphi %s1430_s10, %s1816_s10   ;;  %s1341_s9 = sphi %s1428_s9, %s1815_s9   ;;  %s1337_s1 = sphi %s1426_s1, %s1821_s1   ;;  %s1333_s8 = sphi %s1424_s8, %s1820_s8   ;;  %s1329_s0 = sphi %s1422_s0, %s1819_s0  }
  0x15   : > { %1807 = sst [smem:[#allocation16_spill]] %s1353_s12  ;;  %s871_s15 = sadd.s32 4294967294, %s1357_s13  }
  0x16   : > { %s36_s16 = sadd.s32 1, %s1349_s11  ;;  %s39_s17 = sadd.s32 1, %s1353_s12 }
  0x17   : > { %p37_p5 = scmp.ge.s32.totalorder %s36_s16, 2  ;;  %s872_s18 = sshll.u32 %s1349_s11, 1 }
  0x18   : > { %s128_s19 = sadd.s32 %s1353_s12, %s872_s18  ;;  %s134_s20 = sadd.s32 1, %s1337_s1 }
  0x19   : > { %s1823_s16 = smov (%p37_p5, %s36_s16), 0  ;;  %s1825_s17 = smov (!%p37_p5, %s39_s17), %s1353_s12 }
  0x1a   : > { %1808 = sst [smem:[#allocation17_spill]] %s1823_s16  ;;  %s873_s21 = sshll.u32 %s1823_s16, 1 }
  0x1b   : > { %p144_p6 = scmp.ne.s32.totalorder %s1337_s1, %s1333_s8  ;;  %p41_p7 = scmp.ge.s32.totalorder %s1825_s17, 2 }
  0x1c   : > { %p145_p8 = scmp.eq.s32.totalorder %s870_s14, 3  ;;  %p150_p9 = scmp.ne.s32.totalorder %s1333_s8, %s1329_s0 }
  0x1d   : > { %p151_p10 = scmp.eq.s32.totalorder %s871_s15, 3  ;;  %s1827_s17 = smov (%p41_p7, %s1825_s17), 0 }
  0x1e   : > { %1809 = sst [smem:[#allocation18_spill]] %s1827_s17  ;;  %p1479_p11 = por %p145_p8, %p144_p6 }
  0x1f   : > { %p1483_p12 = por %p151_p10, %p150_p9  ;;  %s130_s24 = sadd.s32 %s873_s21, %s1827_s17 }
  0x20   : > { %p875_p13 = scmp.ge.s32.totalorder %s1357_s13, 1  ;;  %s131_s25 = ssub.s32 %s128_s19, %s130_s24 }
  0x21   : > { %p181_p0 = scmp.lt.s32.totalorder %s1357_s13, 5  ;;  %p132_p1 = scmp.eq.s32.totalorder %s131_s25, 0 }
  0x23   : > { %p182_p2 = pnand %p875_p13, %p181_p0 }
  0x24   : > { %s1491_s26 = scalar_select %p132_p1, %s1337_s1, %s134_s20  }
  0x25   : > { %185 = sbr.rel (%p182_p2) target bundleno = 681 (0x2a9), region = 36  ;;  %s1800_s27 = sand.u32 (!%p182_p2), 1, %s1333_s8  }
  0x26   : > { %s1494_s28 = sld [smem:[#allocation6]] (!%p182_p2)  ;;  %s876_s29 = sshll.u32 (!%p182_p2), %s1800_s27, 6 }
  0x27   : > { %s1801_s30 = sshll.u32 (!%p182_p2), %s1341_s9, 1  ;;  %p208_p3 = scmp.lt.s32.totalorder (!%p182_p2), %s1341_s9, 0 }
  0x28   : > { %s1502_s14 = sadd.s32 (!%p182_p2), %s1345_s10, %s1801_s30  ;;  %s209_s15 = ssub.s32 (!%p182_p2), 0, %s1341_s9 }
  0x29   : > { %s878_s18 = smin.u32 (!%p182_p2), %s1341_s9, %s209_s15  ;;  %s1509_s24 = scalar_lea.vmem (!%p182_p2), [#allocation7], %s876_s29 }
  0x2a   : > { %s211_s19 = sand.u32 (!%p182_p2), 1, %s878_s18   ;;  %p881_p5 = scmp.ne.s32.totalorder (!%p182_p2), %s1341_s9, 0 }
  0x2b   : > { %s212_s20 = ssub.s32 (!%p182_p2), 0, %s211_s19 }
  0x2c   : > { %s1829_s20 = smov (!%p208_p3, %s212_s20), %s211_s19  ;;  %223 = sbr.rel (%p881_p5) target bundleno = 82 (0x52), region = 40 }
  0x2d   : > { %p880_p4 = scmp.lt.s32.totalorder %s1829_s20, 0  ;;  %s218_s21 = sadd.s32 2, %s1829_s20 }
  0x2e   : > { %s882_s25 = sshll.u32 (!%p881_p5), %s1345_s10, 6 }
  0x2f   : > { %s1831_s21 = smov (!%p880_p4, %s218_s21), %s1829_s20  ;;  %s225_s27 = ssub.s32 (!%p881_p5), %s1494_s28, %s882_s25 }
  0x30   : > { %p226_p6 = scmp.gt.s32.totalorder (!%p881_p5), %s225_s27, 0  ;;  %p883_p7 = scmp.lt.s32.totalorder (!%p881_p5), %s225_s27, 64 }
  0x33   : > { %s1833_s27 = smov (!%p226_p6, %s225_s27), 0 }
  0x34   : > { %s1835_s27 = smov (!%p883_p7, %s1833_s27), 64 }
  0x35   : > { %p888_p8 = scmp.le.s32.totalorder %s1835_s27, 0 }
  0x36   : > { %s1359_s15 = smov (!%p888_p8), 0  }
  0x37   : > { %831 = sbr.rel (%p888_p8) target bundleno = 82 (0x52), region = 196 }
  0x3e LB: >> { %s236_s18 = sadd.s32 %s1361_s15, %s882_s25  ;;  %s239_s17 = scalar_lea.vmem [#allocation2], %s1361_s15  ;;  %s1361_s15 = sphi %s1359_s15, %s233_s15  }
  0x3f   : >> { %s237_s29 = sld [smem:[#allocation5 + %s236_s18]] }
  0x45   : >> { %s238_s30 = scalar_lea.vmem %s1794_s2, %s237_s29 }
  0x46   : >> { %v257_v0 = vld [vmem:[%s238_s30] sm:$0x1] }
  0x47   : >> { %258 = vst [vmem:[%s239_s17] sm:$0x1] %v257_v0 }
  0x48   : >> { %283 = vsyncadd [#allocation3], 16  ;;  %s233_s15 = sadd.s32 1, %s1361_s15  }
  0x49   : >> { %p232_p9 = scmp.ge.s32.totalorder %s233_s15, %s1835_s27 }
  0x4b   : > { %235 = sbr.rel (!%p232_p9) target bundleno = 62 (0x3e), region = 202 }
  0x52 PF: > { %s889_s16 = sshll.u32 %s1502_s14, 6  ;;  %s295_s17 = scalar_lea.sflag [#allocation3], %s1831_s21 }
  0x53   : > { %s285_s12 = ssub.s32 %s1494_s28, %s889_s16 }
  0x54   : > { %p286_p10 = scmp.gt.s32.totalorder %s285_s12, 0  ;;  %p890_p13 = scmp.lt.s32.totalorder %s285_s12, 64 }
  0x56   : > { %s1837_s12 = smov (!%p286_p10, %s285_s12), 0 }
  0x57   : > { %s1839_s12 = smov (!%p890_p13, %s1837_s12), 64 }
  0x58   : > { %p1137_p0 = scmp.eq.s32.totalorder %s1839_s12, 64 }
  0x5a   : > { %1318 = dma.done.wait (%p1137_p0), %s295_s17, 1024 }
  0x5b   : > { %1320 = vsyncadd (%p1137_p0), %s295_s17, 4294966272  ;;  %p299_p1 = scmp.gt.s32.totalorder %s1839_s12, 0  ;;  %p300_p2 = scmp.lt.s32.totalorder %s1839_s12, 64 }
  0x5d   : > { %p301_p3 = pnand %p300_p2, %p299_p1 }
  0x5e   : > { %p897_p4 = scmp.le.s32.totalorder (!%p301_p3), %s1839_s12, 0 }
  0x5f   : > { %304 = sbr.rel (%p301_p3) target bundleno = 120 (0x78), region = 85 }
  0x66   : > { %836 = sbr.rel (%p897_p4) target bundleno = 120 (0x78), region = 207  ;;  %s1363_s16 = smov (!%p897_p4), 0  }
  0x6d LB: >> { %1321 = dma.done.wait %s295_s17, 16  ;;  %s1365_s16 = sphi %s1363_s16, %s308_s16  }
  0x6e   : >> { %1322 = vsyncadd %s295_s17, 4294967280  ;;  %s308_s16 = sadd.s32 1, %s1365_s16  }
  0x6f   : >> { %p307_p5 = scmp.ge.s32.totalorder %s308_s16, %s1839_s12 }
  0x71   : > { %310 = sbr.rel (!%p307_p5) target bundleno = 109 (0x6d), region = 213 }
  0x78 PF: > { %s315_s27 = sadd.s32 1, %s1341_s9 }
  0x79   : > { %p898_p6 = scmp.ge.s32.totalorder %s315_s27, 2 }
  0x7a   : > { %s1812_s30 = sshll.u32 (!%p898_p6), %s1341_s9, 1  ;;  %s322_s15 = ssub.s32 (!%p898_p6), 1, %s1831_s21 }
  0x7b   : > { %319 = sbr.rel (%p898_p6) target bundleno = 161 (0xa1), region = 96  ;;  %s925_s25 = sadd.s32 (!%p898_p6), 2, %s1812_s30 }
  0x7c   : > { %s321_s29 = sadd.s32 (!%p898_p6), %s1345_s10, %s925_s25  ;;  %s906_s19 = sshll.u32 (!%p898_p6), %s322_s15, 6 }
  0x7d   : > { %s900_s20 = sshll.u32 (!%p898_p6), %s321_s29, 6 }
  0x7e   : > { %s324_s18 = ssub.s32 (!%p898_p6), %s1494_s28, %s900_s20 }
  0x7f   : > { %p325_p7 = scmp.gt.s32.totalorder (!%p898_p6), %s324_s18, 0  ;;  %p901_p8 = scmp.lt.s32.totalorder (!%p898_p6), %s324_s18, 64 }
  0x82   : > { %s1841_s18 = smov (!%p325_p7, %s324_s18), 0 }
  0x83   : > { %s1843_s18 = smov (!%p901_p8, %s1841_s18), 64 }
  0x84   : > { %p907_p9 = scmp.le.s32.totalorder %s1843_s18, 0 }
  0x85   : > { %s1367_s17 = smov (!%p907_p9), 0  }
  0x86   : > { %841 = sbr.rel (%p907_p9) target bundleno = 161 (0xa1), region = 218 }
  0x8d LB: >> { %s336_s9 = sadd.s32 %s1369_s17, %s900_s20  ;;  %s338_s27 = sadd.s32 %s1369_s17, %s906_s19  ;;  %s1369_s17 = sphi %s1367_s17, %s333_s17  }
  0x8e   : >> { %s337_s16 = sld [smem:[#allocation5 + %s336_s9]]  ;;  %s340_s25 = scalar_lea.vmem [#allocation2], %s338_s27 }
  0x8f   : >> { %s341_s28 = scalar_lea.sflag [#allocation3], %s322_s15 }
  0x94   : >> { %s339_s10 = scalar_lea.vmem %s1794_s2, %s337_s16 }
  0x95   : >> { %v359_v1 = vld [vmem:[%s339_s10] sm:$0x1] }
  0x96   : >> { %360 = vst [vmem:[%s340_s25] sm:$0x1] %v359_v1 }
  0x97   : >> { %385 = vsyncadd %s341_s28, 16  ;;  %s333_s17 = sadd.s32 1, %s1369_s17  }
  0x98   : >> { %p332_p10 = scmp.ge.s32.totalorder %s333_s17, %s1843_s18 }
  0x9a   : > { %335 = sbr.rel (!%p332_p10) target bundleno = 141 (0x8d), region = 224 }
  0xa1 PF: > { %v386_v2 = vlaneseq  ;;  %p908_p13 = scmp.le.s32.totalorder %s1839_s12, 0 }
  0xa2   : > { %v407_v11 = vld [vmem:[%s1795_s3] sm:$0xff] (!%p908_p13)  ;;  %v408_v12 = vld [vmem:[%s1795_s3 + $0x8] sm:$0xff] (!%p908_p13)  ;;  %v409_v13 = vld [vmem:[%s1795_s3 + $0x10] sm:$0xff] (!%p908_p13)  ;;  %s1813_s25 = sshll.u32 (!%p908_p13), %s1831_s21, 6 }
  0xa3   : > { %v1537_v3 = vshrl.u32 %v386_v2, 7  ;;  %397 = sbr.rel (%p908_p13) target bundleno = 646 (0x286), region = 137  ;;  %v1065_v14 = vpack.c.bf16 (!%p908_p13), %v408_v12, %v407_v11  ;;  %v410_v15 = vld [vmem:[%s1795_s3 + $0x18] sm:$0xff] (!%p908_p13)  ;;  %v411_v17 = vld [vmem:[%s1795_s3 + $0x20] sm:$0xff] (!%p908_p13)  ;;  %v412_v18 = vld [vmem:[%s1795_s3 + $0x28] sm:$0xff] (!%p908_p13)  ;;  %s1581_s28 = scalar_lea.vmem (!%p908_p13), [#allocation2], %s1813_s25 }
  0xa4   : > { %v1069_v16 = vpack.c.bf16 (!%p908_p13), %v410_v15, %v409_v13  ;;  %v1073_v19 = vpack.c.bf16 (!%p908_p13), %v412_v18, %v411_v17  ;;  %v1584_v20 = vld [vmem:[%s1581_s28] sm:$0xff] (!%p908_p13)  ;;  %v413_v21 = vld [vmem:[%s1795_s3 + $0x30] sm:$0xff] (!%p908_p13)  ;;  %v414_v22 = vld [vmem:[%s1795_s3 + $0x38] sm:$0xff] (!%p908_p13) }
  0xa5   : > { %v1540_v4 = vadd.s32 8, %v1537_v3  ;;  %v1543_v5 = vadd.s32 16, %v1537_v3  ;;  %v1546_v6 = vadd.s32 24, %v1537_v3  ;;  %v1549_v7 = vadd.s32 32, %v1537_v3  ;;  %1066 = vmatprep.subr.bf16.mxu0 (!%p908_p13), %v1065_v14  ;;  %1009 = vmatprep.mubr.f32.mxu0 (!%p908_p13), %v1584_v20  ;;  %v543_v23 = vld [vmem:[%s1797_s5] sm:$0xff] (!%p908_p13)  ;;  %v544_v24 = vld [vmem:[%s1797_s5 + $0x8] sm:$0xff] (!%p908_p13) }
  0xa6   : > { %v1552_v8 = vadd.s32 40, %v1537_v3  ;;  %v1555_v9 = vadd.s32 48, %v1537_v3  ;;  %v1558_v10 = vadd.s32 56, %v1537_v3  ;;  %1068 = vmatpush3.bf16.msra.mxu0 (!%p908_p13), %v1065_v14  ;;  %v545_v25 = vld [vmem:[%s1797_s5 + $0x10] sm:$0xff] (!%p908_p13)  ;;  %v1077_v26 = vpack.c.bf16 (!%p908_p13), %v414_v22, %v413_v21  ;;  %v415_v27 = vld [vmem:[%s1795_s3 + $0x40] sm:$0xff] (!%p908_p13)  ;;  %v546_v29 = vld [vmem:[%s1797_s5 + $0x18] sm:$0xff] (!%p908_p13) }
  0xa7   : > { %1070 = vmatprep.subr.bf16.mxu0 (!%p908_p13), %v1069_v16  ;;  %v1097_v28 = vpack.c.bf16 (!%p908_p13), %v544_v24, %v543_v23  ;;  %v416_v30 = vld [vmem:[%s1795_s3 + $0x48] sm:$0xff] (!%p908_p13)  ;;  %v1101_v31 = vpack.c.bf16 (!%p908_p13), %v546_v29, %v545_v25  ;;  %v547_v32 = vld [vmem:[%s1797_s5 + $0x20] sm:$0xff] (!%p908_p13)  ;;  %v417_v35 = vld [vmem:[%s1795_s3 + $0x50] sm:$0xff] (!%p908_p13) }
  0xa8   : > { %v548_v33 = vld [vmem:[%s1797_s5 + $0x28] sm:$0xff] (!%p908_p13)  ;;  %v1081_v34 = vpack.c.bf16 (!%p908_p13), %v416_v30, %v415_v27  ;;  %v418_v37 = vld [vmem:[%s1795_s3 + $0x58] sm:$0xff] (!%p908_p13)  ;;  %v549_v38 = vld [vmem:[%s1797_s5 + $0x30] sm:$0xff] (!%p908_p13) }
  0xa9   : > { %1098 = vmatprep.subr.bf16.mxu1 (!%p908_p13), %v1097_v28  ;;  %v1105_v36 = vpack.c.bf16 (!%p908_p13), %v548_v33, %v547_v32  ;;  %v550_v39 = vld [vmem:[%s1797_s5 + $0x38] sm:$0xff] (!%p908_p13)  ;;  %v1085_v40 = vpack.c.bf16 (!%p908_p13), %v418_v37, %v417_v35  ;;  %v419_v41 = vld [vmem:[%s1795_s3 + $0x60] sm:$0xff] (!%p908_p13)  ;;  %v420_v43 = vld [vmem:[%s1795_s3 + $0x68] sm:$0xff] (!%p908_p13) }
  0xaa   : > { %1072 = vmatpush3.bf16.msra.mxu0 %v1069_v16  ;;  %1100 = vmatpush3.bf16.msra.mxu1 %v1097_v28  ;;  %v1109_v42 = vpack.c.bf16 %v550_v39, %v549_v38  ;;  %v551_v44 = vld [vmem:[%s1797_s5 + $0x40] sm:$0xff]  ;;  %v552_v45 = vld [vmem:[%s1797_s5 + $0x48] sm:$0xff]  ;;  %v1089_v46 = vpack.c.bf16 %v420_v43, %v419_v41  ;;  %v421_v47 = vld [vmem:[%s1795_s3 + $0x70] sm:$0xff]  ;;  %v679_v38 = vstv %s1839_s12 }
  0xab   : > { %1074 = vmatprep.subr.bf16.mxu0 %v1073_v19  ;;  %1102 = vmatprep.subr.bf16.mxu1 %v1101_v31  ;;  %v1113_v48 = vpack.c.bf16 %v552_v45, %v551_v44  ;;  %v422_v49 = vld [vmem:[%s1795_s3 + $0x78] sm:$0xff]  ;;  %v553_v50 = vld [vmem:[%s1797_s5 + $0x50] sm:$0xff]  ;;  %v555_v54 = vld [vmem:[%s1797_s5 + $0x60] sm:$0xff]  ;;  %vm681_vm0 = vcmp.lt.s32.totalorder %v1540_v4, %v679_v38  ;;  %vm680_vm1 = vcmp.lt.s32.totalorder %v1537_v3, %v679_v38 }
  0xac   : > { %v554_v51 = vld [vmem:[%s1797_s5 + $0x58] sm:$0xff]  ;;  %v1093_v52 = vpack.c.bf16 %v422_v49, %v421_v47  ;;  %v556_v55 = vld [vmem:[%s1797_s5 + $0x68] sm:$0xff]  ;;  %v1661_v58 = vld [vmem:[%s1581_s28 + $0x10] sm:$0xff]  ;;  %vm683_vm2 = vcmp.lt.s32.totalorder %v1546_v6, %v679_v38  ;;  %vm682_vm3 = vcmp.lt.s32.totalorder %v1543_v5, %v679_v38  ;;  %vm685_vm4 = vcmp.lt.s32.totalorder %v1552_v8, %v679_v38 }
  0xad   : > { %v1117_v53 = vpack.c.bf16 %v554_v51, %v553_v50  ;;  %v1121_v56 = vpack.c.bf16 %v556_v55, %v555_v54  ;;  %v400_v57 = vld [vmem:[%s1581_s28 + $0x8] sm:$0xff]  ;;  %v1665_v59 = vld [vmem:[%s1581_s28 + $0x18] sm:$0xff]  ;;  %v1668_v60 = vld [vmem:[%s1581_s28 + $0x20] sm:$0xff]  ;;  %vm684_vm5 = vcmp.lt.s32.totalorder %v1549_v7, %v679_v38  ;;  %vm687_vm6 = vcmp.lt.s32.totalorder %v1558_v10, %v679_v38 }
  0xae   : > { %1076 = vmatpush3.bf16.msra.mxu0 %v1073_v19  ;;  %1104 = vmatpush3.bf16.msra.mxu1 %v1101_v31  ;;  %v1673_v61 = vld [vmem:[%s1581_s28 + $0x28] sm:$0xff]  ;;  %v1676_v62 = vld [vmem:[%s1581_s28 + $0x30] sm:$0xff]  ;;  %v1681_v63 = vld [vmem:[%s1581_s28 + $0x38] sm:$0xff]  ;;  %vm686_vm7 = vcmp.lt.s32.totalorder %v1555_v9, %v679_v38 }
  0xaf   : > { %1078 = vmatprep.subr.bf16.mxu0 %v1077_v26  ;;  %1106 = vmatprep.subr.bf16.mxu1 %v1105_v36  ;;  %v557_v0 = vld [vmem:[%s1797_s5 + $0x70] sm:$0xff]  ;;  %v558_v1 = vld [vmem:[%s1797_s5 + $0x78] sm:$0xff]  ;;  %v909_v11 = vld [vmem:[%s1796_s4] ss:$0 sm:$0xff] }
  0xb0   : > { %v1125_v2 = vpack.c.bf16 %v558_v1, %v557_v0  ;;  %v910_v37 = vld [vmem:[%s1798_s6] ss:$0 sm:$0xff] }
  0xb2   : > { %1080 = vmatpush3.bf16.msra.mxu0 %v1077_v26  ;;  %1108 = vmatpush3.bf16.msra.mxu1 %v1105_v36 }
  0xb3   : > { %1082 = vmatprep.subr.bf16.mxu0 %v1081_v34  ;;  %1110 = vmatprep.subr.bf16.mxu1 %v1109_v42 }
  0xb6   : > { %1084 = vmatpush3.bf16.msra.mxu0 %v1081_v34  ;;  %1112 = vmatpush3.bf16.msra.mxu1 %v1109_v42 }
  0xb7   : > { %1086 = vmatprep.subr.bf16.mxu0 %v1085_v40  ;;  %1114 = vmatprep.subr.bf16.mxu1 %v1113_v48 }
  0xba   : > { %1088 = vmatpush3.bf16.msra.mxu0 %v1085_v40  ;;  %1116 = vmatpush3.bf16.msra.mxu1 %v1113_v48 }
  0xbb   : > { %1090 = vmatprep.subr.bf16.mxu0 %v1089_v46  ;;  %1118 = vmatprep.subr.bf16.mxu1 %v1117_v53 }
  0xbe   : > { %1092 = vmatpush3.bf16.msra.mxu0 %v1089_v46  ;;  %1120 = vmatpush3.bf16.msra.mxu1 %v1117_v53 }
  0xbf   : > { %1094 = vmatprep.subr.bf16.mxu0 %v1093_v52  ;;  %1122 = vmatprep.subr.bf16.mxu1 %v1121_v56 }
  0xc2   : > { %1096 = vmatpush3.bf16.msra.mxu0 %v1093_v52  ;;  %1124 = vmatpush3.bf16.msra.mxu1 %v1121_v56 }
  0xc3   : > { %1126 = vmatprep.subr.bf16.mxu1 %v1125_v2 }
  0xc5   : > { %1010 = vmatmul.mubr.f32.vlgmr.msra.gmra.mrb[0].mxu0 %v400_v57 }
  0xc6   : > { %1012 = vmatprep.mubr.f32.mxu0 %v1661_v58  ;;  %1128 = vmatpush3.bf16.msra.mxu1 %v1125_v2 }
  0xc9   : > { %1013 = vmatmul.mubr.f32.gmra.mrb[2].mxu0 %v1665_v59 }
  0xca   : > { %1015 = vmatprep.mubr.f32.mxu0 %v1668_v60 }
  0xcd   : > { %1016 = vmatmul.mubr.f32.gmra.mrb[4].mxu0 %v1673_v61 }
  0xce   : > { %1018 = vmatprep.mubr.f32.mxu0 %v1676_v62 }
  0xd1   : > { %1019 = vmatmul.mubr.f32.gmra.mrb[6].mxu0 %v1681_v63 }
 0x198   : > { %v1011_v12 = vpop.f32.mrb[0].mxu0 }
 0x199   : > { %v502_v13 = vadd.f32 %v1011_v12, %v909_v11  ;;  %v496_v14 = vpop.f32.mrb[1].mxu0 }
 0x19a   : > { %v497_v15 = vadd.f32 %v909_v11, %v496_v14 }
 0x19b   : > { %v536_v18 = vmax.f32 %v502_v13, 0.0 }
 0x19c   : > { %v1014_v16 = vpop.f32.mrb[2].mxu0  ;;  %v535_v17 = vmax.f32 %v497_v15, 0.0 }
 0x19d   : > { %v512_v19 = vadd.f32 %v1014_v16, %v909_v11  ;;  %v506_v21 = vpop.f32.mrb[3].mxu0 }
 0x19e   : > { %v507_v22 = vadd.f32 %v909_v11, %v506_v21  ;;  %1053 = vmatprep.mubr.f32.mxu1 %v535_v17 }
 0x19f   : > { %1054 = vmatmul.mubr.f32.vlgmr.msra.gmra.mrb[0].mxu1 %v536_v18  ;;  %v538_v25 = vmax.f32 %v512_v19, 0.0 }
 0x1a0   : > { %v537_v23 = vmax.f32 %v507_v22, 0.0  ;;  %v1017_v24 = vpop.f32.mrb[4].mxu0 }
 0x1a1   : > { %v522_v26 = vadd.f32 %v1017_v24, %v909_v11  ;;  %v516_v27 = vpop.f32.mrb[5].mxu0 }
 0x1a2   : > { %v517_v28 = vadd.f32 %v909_v11, %v516_v27  ;;  %1056 = vmatprep.mubr.f32.mxu1 %v537_v23 }
 0x1a3   : > { %1057 = vmatmul.mubr.f32.gmra.mrb[2].mxu1 %v538_v25  ;;  %v540_v31 = vmax.f32 %v522_v26, 0.0 }
 0x1a4   : > { %v539_v29 = vmax.f32 %v517_v28, 0.0  ;;  %v1020_v30 = vpop.f32.mrb[6].mxu0 }
 0x1a5   : > { %v532_v32 = vadd.f32 %v1020_v30, %v909_v11  ;;  %v526_v33 = vpop.f32.mrb[7].mxu0 }
 0x1a6   : > { %v527_v34 = vadd.f32 %v909_v11, %v526_v33  ;;  %1059 = vmatprep.mubr.f32.mxu1 %v539_v29 }
 0x1a7   : > { %1060 = vmatmul.mubr.f32.gmra.mrb[4].mxu1 %v540_v31  ;;  %v542_v36 = vmax.f32 %v532_v32, 0.0 }
 0x1a8   : > { %v541_v35 = vmax.f32 %v527_v34, 0.0 }
 0x1aa   : > { %1062 = vmatprep.mubr.f32.mxu1 %v541_v35 }
 0x1ab   : > { %1063 = vmatmul.mubr.f32.gmra.mrb[6].mxu1 %v542_v36 }
 0x272   : > { %v1055_v39 = vpop.f32.mrb[0].mxu1 }
 0x273   : > { %v638_v40 = vadd.f32 %v1055_v39, %v910_v37  ;;  %v632_v41 = vpop.f32.mrb[1].mxu1 }
 0x274   : > { %v633_v42 = vadd.f32 %v910_v37, %v632_v41 }
 0x275   : > { %v672_v43 = vadd.f32 %v638_v40, %v400_v57 }
 0x276   : > { %v671_v44 = vadd.f32 %v633_v42, %v1584_v20  ;;  %v1058_v45 = vpop.f32.mrb[2].mxu1 }
 0x277   : > { %v705_v46 = vsel %vm681_vm0, %v672_v43, 0.0  ;;  %v648_v47 = vadd.f32 %v1058_v45, %v910_v37  ;;  %v642_v48 = vpop.f32.mrb[3].mxu1 }
 0x278   : > { %713 = vst [vmem:[%s1509_s24 + $0x8] sm:$0xff] %v705_v46  ;;  %v704_v49 = vsel %vm680_vm1, %v671_v44, 0.0  ;;  %v643_v50 = vadd.f32 %v910_v37, %v642_v48 }
 0x279   : > { %712 = vst [vmem:[%s1509_s24] sm:$0xff] %v704_v49  ;;  %v674_v4 = vadd.f32 %v648_v47, %v1665_v59 }
 0x27a   : > { %v673_v3 = vadd.f32 %v643_v50, %v1661_v58  ;;  %v1061_v51 = vpop.f32.mrb[4].mxu1 }
 0x27b   : > { %v707_v20 = vsel %vm683_vm2, %v674_v4, 0.0  ;;  %v658_v52 = vadd.f32 %v1061_v51, %v910_v37  ;;  %v652_v53 = vpop.f32.mrb[5].mxu1 }
 0x27c   : > { %715 = vst [vmem:[%s1509_s24 + $0x18] sm:$0xff] %v707_v20  ;;  %v706_v54 = vsel %vm682_vm3, %v673_v3, 0.0  ;;  %v653_v55 = vadd.f32 %v910_v37, %v652_v53 }
 0x27d   : > { %714 = vst [vmem:[%s1509_s24 + $0x10] sm:$0xff] %v706_v54  ;;  %v676_v6 = vadd.f32 %v658_v52, %v1673_v61 }
 0x27e   : > { %v675_v5 = vadd.f32 %v653_v55, %v1668_v60  ;;  %v1064_v56 = vpop.f32.mrb[6].mxu1 }
 0x27f   : > { %v709_v57 = vsel %vm685_vm4, %v676_v6, 0.0  ;;  %v668_v58 = vadd.f32 %v1064_v56, %v910_v37  ;;  %v662_v59 = vpop.f32.mrb[7].mxu1 }
 0x280   : > { %717 = vst [vmem:[%s1509_s24 + $0x28] sm:$0xff] %v709_v57  ;;  %v708_v0 = vsel %vm684_vm5, %v675_v5, 0.0  ;;  %v663_v1 = vadd.f32 %v910_v37, %v662_v59 }
 0x281   : > { %716 = vst [vmem:[%s1509_s24 + $0x20] sm:$0xff] %v708_v0  ;;  %v678_v8 = vadd.f32 %v668_v58, %v1681_v63 }
 0x282   : > { %v677_v61 = vadd.f32 %v663_v1, %v1676_v62 }
 0x283   : > { %v711_v7 = vsel %vm687_vm6, %v678_v8, 0.0 }
 0x284   : > { %719 = vst [vmem:[%s1509_s24 + $0x38] sm:$0xff] %v711_v7  ;;  %v710_v60 = vsel %vm686_vm7, %v677_v61, 0.0 }
 0x285   : > { %718 = vst [vmem:[%s1509_s24 + $0x30] sm:$0xff] %v710_v60 }
 0x286 PF: > { %p911_p0 = scmp.ne.s32.totalorder %s1839_s12, 0 }
 0x287   : > { %v1372_v2 = vmov (!%p911_p0), 0.0  }
 0x288   : > { %723 = sbr.rel (%p911_p0) target bundleno = 655 (0x28f), region = 141  ;;  %724 = vst [vmem:[%s1509_s24] sm:$0xff] (!%p911_p0), %v1372_v2  ;;  %725 = vst [vmem:[%s1509_s24 + $0x8] sm:$0xff] (!%p911_p0), %v1372_v2 }
 0x289   : > { %726 = vst [vmem:[%s1509_s24 + $0x10] sm:$0xff] (!%p911_p0), %v1372_v2  ;;  %727 = vst [vmem:[%s1509_s24 + $0x18] sm:$0xff] (!%p911_p0), %v1372_v2 }
 0x28a   : > { %728 = vst [vmem:[%s1509_s24 + $0x20] sm:$0xff] (!%p911_p0), %v1372_v2  ;;  %729 = vst [vmem:[%s1509_s24 + $0x28] sm:$0xff] (!%p911_p0), %v1372_v2 }
 0x28b   : > { %730 = vst [vmem:[%s1509_s24 + $0x30] sm:$0xff] (!%p911_p0), %v1372_v2  ;;  %731 = vst [vmem:[%s1509_s24 + $0x38] sm:$0xff] (!%p911_p0), %v1372_v2 }
 0x28f PF: > { %s928_s12 = sshll.u32 %s1502_s14, 10  ;;  %s748_s15 = sshll.u32 %s1509_s24, 4  ;;  %s1736_s15 = int_to_ptr.vmem [resolvable:$true] %s748_s15 }
 0x290   : > { %s1733_s18 = scalar_lea.hbm %s1799_s7, %s928_s12  ;;  %s1814_s29 = sand.u32 1, %s1333_s8  }
 0x291   : > { %s1740_s19 = scalar_lea.sflag [#allocation8], %s1814_s29  ;;  %s1243_s20 = scalar_lea.vmem %s1736_s15, 1024 }
 0x292   : > { %p1244_p1 = scmp.ne.s32.totalorder %s1736_s15, %s1243_s20  ;;  %s1373_s14 = smov [#allocation7]  }
 0x293   : > { %s1247_s21 = sshll.u32 %s1373_s14, 4  ;;  %s1248_s21 = int_to_ptr.vmem [resolvable:$false] %s1247_s21 }
 0x294   : > { %p1245_p2 = pnand %p1244_p1, %p1479_p11  ;;  %s1249_s17 = scalar_lea.vmem %s1248_s21, 2048 }
 0x295   : > { %p1250_p4 = scmp.lt.s32.totalorder %s1736_s15, %s1248_s21  ;;  %p1251_p5 = scmp.lt.s32.totalorder %s1249_s17, %s1243_s20 }
 0x296   : > { %p1246_p3 = pneg %p1245_p2 }
 0x297   : > { %p1252_p6 = por %p1251_p5, %p1250_p4 }
 0x299   : > { %p1253_p7 = pnand %p1252_p6, %p1246_p3 }
 0x29b   : > { %1256 = shalt.err (!%p1253_p7)
}
 0x29c   : > { %s1257_s24 = scalar_lea.hbm %s1733_s18, 1024  ;;  %s1261_s27 = scalar_lea.hbm %s1799_s7, 4096 }
 0x29d   : > { %p1258_p8 = scmp.ne.s32.totalorder %s1733_s18, %s1257_s24  ;;  %p1262_p13 = scmp.lt.u32.totalorder %s1733_s18, %s1799_s7 }
 0x29e   : > { %p1263_p0 = scmp.lt.u32.totalorder %s1261_s27, %s1257_s24  ;;  %p1265_p2 = scmp.lt.u32.totalorder %s1257_s24, %s1733_s18 }
 0x29f   : > { %p1259_p9 = pnand %p1258_p8, %p1479_p11 }
 0x2a0   : > { %p1264_p1 = por %p1263_p0, %p1262_p13 }
 0x2a1   : > { %p1260_p10 = pneg %p1259_p9 }
 0x2a2   : > { %p1266_p3 = por %p1265_p2, %p1264_p1 }
 0x2a4   : > { %p1267_p4 = pnand %p1266_p3, %p1260_p10 }
 0x2a6   : > { %1270 = shalt.err (!%p1267_p4)
}
 0x2a7   : > { %s1374_s10 = smov 128   ;;  %s1375_s12 = smov 8  }
 0x2a8   : > { %1131 = dma.vmem_to_hbm [thread:$0]  (%p1479_p11), %s1736_s15, 1024, %s1733_s18, %s1740_s19, %s1374_s10, %s1374_s10, %s1375_s12  }
 0x2a9 PF: > { %p1138_p5 = scmp.ge.s32.totalorder %s1357_s13, 2  ;;  %s763_s25 = sand.u32 1, %s1329_s0  }
 0x2aa   : > { %s764_s11 = scalar_lea.sflag [#allocation8], %s763_s25 }
 0x2ab   : > { %p1134_p6 = pnand %p1138_p5, %p1483_p12 }
 0x2ad   : > { %1324 = dma.done.wait (!%p1134_p6), %s764_s11, 1024  }
 0x2ae   : > { %1326 = vsyncadd (!%p1134_p6), %s764_s11, 4294966272  ;;  %s27_s13 = sadd.s32 1, %s1357_s13   ;;  %s1815_s9 = sld [smem:[#allocation15_spill]] }
 0x2af   : > { %p24_p7 = scmp.ge.s32.totalorder %s27_s13, 6   ;;  %s1816_s10 = sld [smem:[#allocation16_spill]] }
 0x2b0   : > { %s1817_s11 = sld [smem:[#allocation17_spill]]  ;;  %s1818_s12 = sld [smem:[#allocation18_spill]] }
 0x2b1   : > { %s1819_s0 = smov %s1333_s8  ;;  %s1820_s8 = smov %s1337_s1 }
 0x2b2   : > { %s1821_s1 = smov %s1491_s26  ;;  %26 = sbr.rel (!%p24_p7) target bundleno = 20 (0x14), region = 235 }
 0x2b9   :  { %769 = vsyncpa [#allocation8], 1 }
 0x2ba   :  { %771 = vsyncpa [#allocation8 + $0x1], 1 }
 0x2bb   :  { %772 = vsyncmov [#allocation3] }
 0x2be   :  { %s773_s22 = vpop.sfrf %772 }
 0x2bf   :  { %p918_p11 = scmp.ne.s32.totalorder %s773_s22, 0 }
 0x2c1   :  { %777 = shalt.err (%p918_p11)  }
 0x2c2   :  { %779 = vsyncmov [#allocation3 + $0x1] }
 0x2c5   :  { %s780_s23 = vpop.sfrf %779 }
 0x2c6   :  { %p919_p12 = scmp.ne.s32.totalorder %s780_s23, 0 }
 0x2c8   :  { %784 = shalt.err (%p919_p12)  }

</bundles_post_ra>
